<compile_context>
chip_gen: v7x
topology: tpu7x:2x2x1
jax: 0.10.0
libtpu: 0.0.40
codegen_flags: <defaults>
</compile_context>

<pallas_src>
import functools

import jax
import jax.numpy as jnp
import numpy as np
from jax.experimental import pallas as pl
from jax.experimental.pallas import tpu as pltpu

_LANES = 128
_SUBLANE_MULT = 32  # LCM of f32 (8), bf16 (16) and int8 (32) sublane packing


def _round_up(v, m):
    return -(-v // m) * m


def _psss_kernel(scales_ref, shifts_ref, idx_ref, x_ref, o_ref, *, num_types):
    """One grid step processes a lane-dense (block_rows, 128) tile of atoms."""
    idx = idx_ref[...].astype(jnp.int32)       # (R, 128) int8 -> int32 for compares
    x = x_ref[...].astype(jnp.float32)         # (R, 128) f32 (upcast if bf16 input)

    # (T-1)-deep compare/select chain fed from SMEM scalars (pure VPU).
    # Seeded with type-0 params; any index != 1..T-1 (incl. padded rows, which
    # carry species 0) therefore resolves to scales[0]/shifts[0].
    scale = jnp.full_like(x, scales_ref[0])
    shift = jnp.full_like(x, shifts_ref[0])
    for k in range(1, num_types):              # static, tiny T -> fully unrolled
        m = idx == k
        scale = jnp.where(m, scales_ref[k], scale)
        shift = jnp.where(m, shifts_ref[k], shift)

    # Fused multiply-add in f32 (matches torch.addcmul in default_dtype).
    o_ref[...] = (shift + scale * x).astype(o_ref.dtype)


@functools.partial(jax.jit, static_argnames=("block_rows", "out_dtype"))
def per_species_scale_shift(species_idx, x, scales, shifts, *,
                            block_rows=2048, out_dtype=jnp.float32):
    """species_idx: (N,) or (N,1) int; x: (N, 1) float (f32 or bf16);
    scales/shifts: (T,) float.

    Returns (N, 1) out_dtype = shifts[species_idx] + scales[species_idx] * x,
    computed in float32.  Atoms are folded onto the TPU lane axis:
    (N, 1) -> (ceil(N/128), 128).
    """
    n, f = x.shape
    assert f == 1, "PerSpeciesScaleShift acts on a '0e' (scalar) per-atom field"
    t = int(scales.shape[0])
    assert int(shifts.shape[0]) == t, "scales/shifts must both have num_types entries"
    assert t <= 127, "species indices are carried as int8; num_types must be <= 127"

    x_flat = x.reshape(n)                                 # keep caller's dtype
    idx_flat = species_idx.reshape(n).astype(jnp.int8)    # valid since t <= 127

    rows = -(-n // _LANES)                                # ceil(N / 128)

    # Adaptive block size:
    #   * target ~block_rows rows per step (amortizes ~0.35 us/step overhead),
    #   * >= 2 blocks whenever rows allow (keeps both v7x TensorCores busy),
    #   * block rows a multiple of 32 (f32/bf16/int8 sublane packing),
    #   * padding waste bounded to < one block.
    target = max(1, min(block_rows, rows))
    nblk = max(1, -(-rows // target))
    if rows >= 2 * _SUBLANE_MULT:
        nblk = max(nblk, 2)
    brows = _round_up(-(-rows // nblk), _SUBLANE_MULT)
    rows_pad = _round_up(rows, brows)
    n_pad = rows_pad * _LANES

    if n_pad != n:
        # Padded atoms get species 0 and x = 0, i.e. they compute shifts[0];
        # those rows are sliced off below, so this is harmless.
        x_flat = jnp.pad(x_flat, (0, n_pad - n))
        idx_flat = jnp.pad(idx_flat, (0, n_pad - n))

    x2d = x_flat.reshape(rows_pad, _LANES)
    idx2d = idx_flat.reshape(rows_pad, _LANES)

    grid = (rows_pad // brows,)
    out2d = pl.pallas_call(
        functools.partial(_psss_kernel, num_types=t),
        out_shape=jax.ShapeDtypeStruct((rows_pad, _LANES), out_dtype),
        grid_spec=pltpu.PrefetchScalarGridSpec(
            num_scalar_prefetch=2,                         # scales, shifts -> SMEM
            grid=grid,
            in_specs=[
                pl.BlockSpec((brows, _LANES), lambda i, sc, sh: (i, 0)),  # species idx
                pl.BlockSpec((brows, _LANES), lambda i, sc, sh: (i, 0)),  # x
            ],
            out_specs=pl.BlockSpec((brows, _LANES), lambda i, sc, sh: (i, 0)),
        ),
        compiler_params=pltpu.CompilerParams(
            dimension_semantics=("parallel",),             # megacore sharding
        ),
    )(scales.astype(jnp.float32), shifts.astype(jnp.float32), idx2d, x2d)

    return out2d.reshape(n_pad, 1)[:n]


if __name__ == "__main__":
    # Deterministic synthetic setup consistent with the module's __init__:
    # num_types = 4, per-atom scalar ('0e') field -> x shape (N, 1).
    num_types = 4
    key = jax.random.PRNGKey(0)
    k_idx, k_x, k_sc, k_sh = jax.random.split(key, 4)

    # Learnable per-type parameters, initialized deterministically in-script.
    scales = 1.0 + 0.1 * jax.random.normal(k_sc, (num_types,), dtype=jnp.float32)
    shifts = 0.5 * jax.random.normal(k_sh, (num_types,), dtype=jnp.float32)

    # Case 1: f32 field, N not a multiple of 128 (exercises padding), single block.
    n1 = 1000
    idx1 = jax.random.randint(k_idx, (n1,), 0, num_types, dtype=jnp.int32)
    x1 = jax.random.normal(k_x, (n1, 1), dtype=jnp.float32)
    out1 = jax.block_until_ready(per_species_scale_shift(idx1, x1, scales, shifts))
    ref1 = shifts[idx1][:, None] + scales[idx1][:, None] * x1
    np.testing.assert_allclose(np.asarray(out1), np.asarray(ref1), rtol=1e-6, atol=1e-6)

    # Case 2: bf16 model_dtype field (reduced input HBM traffic), multi-block grid;
    # output stays f32 (default_dtype), matching torch promotion in addcmul.
    n2 = 9000
    k_idx2, k_x2 = jax.random.split(k_x)
    idx2 = jax.random.randint(k_idx2, (n2,), 0, num_types, dtype=jnp.int32)
    x2 = jax.random.normal(k_x2, (n2, 1), dtype=jnp.float32).astype(jnp.bfloat16)
    out2 = jax.block_until_ready(per_species_scale_shift(idx2, x2, scales, shifts))
    ref2 = shifts[idx2][:, None] + scales[idx2][:, None] * x2.astype(jnp.float32)
    np.testing.assert_allclose(np.asarray(out2), np.asarray(ref2), rtol=1e-6, atol=1e-6)

    print("KERNEL_OK")
</pallas_src>

<mosaic_0001>
module attributes {stable_mosaic.version = 11 : i64} {
  func.func @_psss_kernel(%arg0: i32, %arg1: memref<4xf32, #tpu.memory_space<smem>>, %arg2: memref<4xf32, #tpu.memory_space<smem>>, %arg3: memref<32x128xi8, #tpu.memory_space<vmem>>, %arg4: memref<32x128xf32, #tpu.memory_space<vmem>>, %arg5: memref<32x128xf32, #tpu.memory_space<vmem>>) attributes {dimension_semantics = [#tpu.dimension_semantics<parallel>], iteration_bounds = array<i64: 1>, scalar_prefetch = 2 : i64, scratch_operands = 0 : i64, tpu.core_type = #tpu.core_type<tc>, window_params = [{transform_indices = @transform_0, window_bounds = array<i64: 32, 128>}, {transform_indices = @transform_1, window_bounds = array<i64: 32, 128>}, {transform_indices = @transform_2, window_bounds = array<i64: 32, 128>}]} {
    %c0 = arith.constant 0 : index
    %c0_0 = arith.constant 0 : index
    %0 = vector.load %arg3[%c0, %c0_0] : memref<32x128xi8, #tpu.memory_space<vmem>>, vector<32x128xi8>
    %1 = arith.extsi %0 : vector<32x128xi8> to vector<32x128xi32>
    %c0_1 = arith.constant 0 : index
    %c0_2 = arith.constant 0 : index
    %2 = vector.load %arg4[%c0_1, %c0_2] : memref<32x128xf32, #tpu.memory_space<vmem>>, vector<32x128xf32>
    %c0_3 = arith.constant 0 : index
    %3 = memref.load %arg1[%c0_3] : memref<4xf32, #tpu.memory_space<smem>>
    %4 = vector.broadcast %3 : f32 to vector<32x128xf32>
    %c0_4 = arith.constant 0 : index
    %5 = memref.load %arg2[%c0_4] : memref<4xf32, #tpu.memory_space<smem>>
    %6 = vector.broadcast %5 : f32 to vector<32x128xf32>
    %c1_i32 = arith.constant 1 : i32
    %7 = vector.broadcast %c1_i32 : i32 to vector<32x128xi32>
    %8 = arith.cmpi eq, %1, %7 : vector<32x128xi32>
    %c1 = arith.constant 1 : index
    %9 = memref.load %arg1[%c1] : memref<4xf32, #tpu.memory_space<smem>>
    %10 = vector.broadcast %9 : f32 to vector<32x128xf32>
    %11 = arith.select %8, %10, %4 : vector<32x128xi1>, vector<32x128xf32>
    %c1_5 = arith.constant 1 : index
    %12 = memref.load %arg2[%c1_5] : memref<4xf32, #tpu.memory_space<smem>>
    %13 = vector.broadcast %12 : f32 to vector<32x128xf32>
    %14 = arith.select %8, %13, %6 : vector<32x128xi1>, vector<32x128xf32>
    %c2_i32 = arith.constant 2 : i32
    %15 = vector.broadcast %c2_i32 : i32 to vector<32x128xi32>
    %16 = arith.cmpi eq, %1, %15 : vector<32x128xi32>
    %c2 = arith.constant 2 : index
    %17 = memref.load %arg1[%c2] : memref<4xf32, #tpu.memory_space<smem>>
    %18 = vector.broadcast %17 : f32 to vector<32x128xf32>
    %19 = arith.select %16, %18, %11 : vector<32x128xi1>, vector<32x128xf32>
    %c2_6 = arith.constant 2 : index
    %20 = memref.load %arg2[%c2_6] : memref<4xf32, #tpu.memory_space<smem>>
    %21 = vector.broadcast %20 : f32 to vector<32x128xf32>
    %22 = arith.select %16, %21, %14 : vector<32x128xi1>, vector<32x128xf32>
    %c3_i32 = arith.constant 3 : i32
    %23 = vector.broadcast %c3_i32 : i32 to vector<32x128xi32>
    %24 = arith.cmpi eq, %1, %23 : vector<32x128xi32>
    %c3 = arith.constant 3 : index
    %25 = memref.load %arg1[%c3] : memref<4xf32, #tpu.memory_space<smem>>
    %26 = vector.broadcast %25 : f32 to vector<32x128xf32>
    %27 = arith.select %24, %26, %19 : vector<32x128xi1>, vector<32x128xf32>
    %c3_7 = arith.constant 3 : index
    %28 = memref.load %arg2[%c3_7] : memref<4xf32, #tpu.memory_space<smem>>
    %29 = vector.broadcast %28 : f32 to vector<32x128xf32>
    %30 = arith.select %24, %29, %22 : vector<32x128xi1>, vector<32x128xf32>
    %31 = arith.mulf %27, %2 : vector<32x128xf32>
    %32 = arith.addf %30, %31 : vector<32x128xf32>
    %c0_8 = arith.constant 0 : index
    %c0_9 = arith.constant 0 : index
    %33 = vector.load %arg5[%c0_8, %c0_9] : memref<32x128xf32, #tpu.memory_space<vmem>>, vector<32x128xf32>
    tpu.vector_store %arg5[%c0_8, %c0_9], %32 {strides = array<i32>} : memref<32x128xf32, #tpu.memory_space<vmem>>, vector<32x128xf32>,
    return
  }
  func.func @transform_0(%arg0: i32, %arg1: memref<4xf32, #tpu.memory_space<smem>>, %arg2: memref<4xf32, #tpu.memory_space<smem>>) -> (i32, i32) {
    %c0_i32 = arith.constant 0 : i32
    %c0_i32_0 = arith.constant 0 : i32
    return %arg0, %c0_i32 : i32, i32
  }
  func.func @transform_1(%arg0: i32, %arg1: memref<4xf32, #tpu.memory_space<smem>>, %arg2: memref<4xf32, #tpu.memory_space<smem>>) -> (i32, i32) {
    %c0_i32 = arith.constant 0 : i32
    %c0_i32_0 = arith.constant 0 : i32
    return %arg0, %c0_i32 : i32, i32
  }
  func.func @transform_2(%arg0: i32, %arg1: memref<4xf32, #tpu.memory_space<smem>>, %arg2: memref<4xf32, #tpu.memory_space<smem>>) -> (i32, i32) {
    %c0_i32 = arith.constant 0 : i32
    %c0_i32_0 = arith.constant 0 : i32
    return %arg0, %c0_i32 : i32, i32
  }
}

</mosaic_0001>

<bundles_post_ra>
// kernel: per_species_scale_shift.1
= control target key start
LH: loop header
LB: loop body
LE: loop exit
PB: predicated region body
PF: predicated region fallthrough
CT: control target
= control target key end

     0   :  { %s218_s0 = inlined_call_operand.vmem [shape: f32[4], index: 0, kind: input, shape index: {}]   ;;  %s219_s2 = inlined_call_operand.vmem [shape: s8[32,128], index: 2, kind: input, shape index: {}]   ;;  %s220_s3 = inlined_call_operand.vmem [shape: f32[32,128], index: 3, kind: input, shape index: {}]   ;;  %s221_s4 = inlined_call_operand.vmem [shape: f32[32,128], index: 4, kind: output, shape index: {}]   ;;  %s222_s1 = inlined_call_operand.vmem [shape: f32[4], index: 1, kind: input, shape index: {}]  }
   0x1   :  { %s9_s17 = sshll.u32 %s218_s0, 4  ;;  %s13_s20 = sshll.u32 %s222_s1, 4  ;;  %s10_s17 = int_to_ptr.vmem [resolvable:$true] %s9_s17  ;;  %s14_s20 = int_to_ptr.vmem [resolvable:$true] %s13_s20 }
   0x2   :  { %s108_s21 = scalar_lea.vmem %s10_s17, 16  ;;  %p113_p1 = scmp.lt.s32.totalorder %s10_s17, %s10_s17 }
   0x3   :  { %p109_p0 = scmp.ne.s32.totalorder %s10_s17, %s108_s21  ;;  %p114_p2 = scmp.lt.s32.totalorder %s108_s21, %s108_s21 }
   0x5   :  { %p115_p3 = por %p114_p2, %p113_p1 }
   0x7   :  { %p116_p4 = pnand %p115_p3, %p109_p0 }
   0x9   :  { %119 = shalt.err (!%p116_p4)  }
   0xa   :  { %s134_s22 = smov [#allocation3]   ;;  %s120_s23 = scalar_lea.vmem %s14_s20, 16 }
   0xb   :  { %12 = dma.vmem_to_smem %s10_s17, 16, %s134_s22, [#allocation2] }
   0xc   :  { %p121_p5 = scmp.ne.s32.totalorder %s14_s20, %s120_s23  ;;  %p125_p6 = scmp.lt.s32.totalorder %s14_s20, %s14_s20 }
   0xd   :  { %p126_p7 = scmp.lt.s32.totalorder %s120_s23, %s120_s23 }
   0xf   :  { %p127_p8 = por %p126_p7, %p125_p6 }
  0x11   :  { %p128_p9 = pnand %p127_p8, %p121_p5 }
  0x13   :  { %131 = shalt.err (!%p128_p9)  }
  0x14   :  { %s135_s0 = smov [#allocation4]  }
  0x15   :  { %16 = dma.vmem_to_smem %s14_s20, 16, %s135_s0, [#allocation2] }
  0x16   :  { %132 = dma.done.wait [#allocation2], 32 }
  0x17   :  { %133 = vsyncadd [#allocation2], 4294967264 }
  0x18   :  { %18 = sfence }
  0x19   :  { %v23_v0 = vld [vmem:[%s219_s2] sm:$0xff]  ;;  %s32_s25 = sld [smem:[#allocation3]]  ;;  %s100_s27 = sld [smem:[#allocation3 + $0x1]]  ;;  %v29_v17 = vld [vmem:[%s220_s3 + $0x8] sm:$0xff]  ;;  %v30_v29 = vld [vmem:[%s220_s3 + $0x10] sm:$0xff] }
  0x1a   :  { %s34_s26 = sld [smem:[#allocation4]]  ;;  %v24_v1 = vunpack.c.0.s8 %v23_v0  ;;  %s101_s28 = sld [smem:[#allocation4 + $0x1]]  ;;  %v25_v2 = vunpack.c.1.s8 %v23_v0  ;;  %v26_v3 = vunpack.c.2.s8 %v23_v0  ;;  %v27_v4 = vunpack.c.3.s8 %v23_v0  ;;  %v28_v9 = vld [vmem:[%s220_s3] sm:$0xff]  ;;  %v31_v39 = vld [vmem:[%s220_s3 + $0x18] sm:$0xff] }
  0x1b   :  { %s102_s29 = sld [smem:[#allocation3 + $0x2]]  ;;  %s104_s5 = sld [smem:[#allocation3 + $0x3]] }
  0x1c   :  { %s103_s30 = sld [smem:[#allocation4 + $0x2]]  ;;  %vm36_vm0 = vcmp.eq.s32.totalorder %v24_v1, 1  ;;  %vm52_vm1 = vcmp.eq.s32.totalorder %v24_v1, 2  ;;  %vm68_vm2 = vcmp.eq.s32.totalorder %v24_v1, 3  ;;  %s105_s6 = sld [smem:[#allocation4 + $0x3]]  ;;  %vm37_vm3 = vcmp.eq.s32.totalorder %v25_v2, 1 }
  0x1d   :  { %vm53_vm4 = vcmp.eq.s32.totalorder %v25_v2, 2  ;;  %vm69_vm5 = vcmp.eq.s32.totalorder %v25_v2, 3  ;;  %vm38_vm6 = vcmp.eq.s32.totalorder %v26_v3, 1  ;;  %vm54_vm7 = vcmp.eq.s32.totalorder %v26_v3, 2 }
  0x1e   :  { %vm70_vm8 = vcmp.eq.s32.totalorder %v26_v3, 3  ;;  %vm39_vm9 = vcmp.eq.s32.totalorder %v27_v4, 1  ;;  %vm55_vm10 = vcmp.eq.s32.totalorder %v27_v4, 2  ;;  %vm71_vm11 = vcmp.eq.s32.totalorder %v27_v4, 3 }
  0x1f   :  { %v33_v5 = vstv %s32_s25  ;;  %v41_v7 = vstv %s100_s27 }
  0x20   :  { %v35_v6 = vstv %s34_s26  ;;  %v47_v8 = vstv %s101_s28  ;;  %v42_v10 = vsel %vm36_vm0, %v41_v7, %v33_v5  ;;  %v43_v18 = vsel %vm37_vm3, %v41_v7, %v33_v5 }
  0x21   :  { %v48_v11 = vsel %vm36_vm0, %v47_v8, %v35_v6  ;;  %v57_v12 = vstv %s102_s29  ;;  %v73_v16 = vstv %s104_s5  ;;  %v49_v21 = vsel %vm37_vm3, %v47_v8, %v35_v6 }
  0x22   :  { %v63_v13 = vstv %s103_s30  ;;  %v58_v14 = vsel %vm52_vm1, %v57_v12, %v42_v10  ;;  %v79_v20 = vstv %s105_s6  ;;  %v59_v22 = vsel %vm53_vm4, %v57_v12, %v43_v18 }
  0x23   :  { %v64_v15 = vsel %vm52_vm1, %v63_v13, %v48_v11  ;;  %v74_v19 = vsel %vm68_vm2, %v73_v16, %v58_v14  ;;  %v65_v25 = vsel %vm53_vm4, %v63_v13, %v49_v21  ;;  %v75_v26 = vsel %vm69_vm5, %v73_v16, %v59_v22 }
  0x24   :  { %v80_v23 = vsel %vm68_vm2, %v79_v20, %v64_v15  ;;  %v84_v24 = vmul.f32 %v74_v19, %v28_v9  ;;  %v81_v27 = vsel %vm69_vm5, %v79_v20, %v65_v25  ;;  %v85_v28 = vmul.f32 %v75_v26, %v29_v17 }
  0x25   :  { %v44_v30 = vsel %vm38_vm6, %v41_v7, %v33_v5  ;;  %v50_v31 = vsel %vm38_vm6, %v47_v8, %v35_v6  ;;  %v45_v35 = vsel %vm39_vm9, %v41_v7, %v33_v5  ;;  %v51_v40 = vsel %vm39_vm9, %v47_v8, %v35_v6 }
  0x26   :  { %v88_v32 = vadd.f32 %v84_v24, %v80_v23  ;;  %v60_v33 = vsel %vm54_vm7, %v57_v12, %v44_v30  ;;  %v66_v34 = vsel %vm54_vm7, %v63_v13, %v50_v31  ;;  %v89_v36 = vadd.f32 %v85_v28, %v81_v27 }
  0x27   :  { %v76_v37 = vsel %vm70_vm8, %v73_v16, %v60_v33  ;;  %v82_v38 = vsel %vm70_vm8, %v79_v20, %v66_v34  ;;  %v61_v42 = vsel %vm55_vm10, %v57_v12, %v45_v35  ;;  %v67_v43 = vsel %vm55_vm10, %v63_v13, %v51_v40 }
  0x28   :  { %92 = vst [vmem:[%s221_s4] sm:$0xff] %v88_v32  ;;  %v86_v41 = vmul.f32 %v76_v37, %v30_v29  ;;  %93 = vst [vmem:[%s221_s4 + $0x8] sm:$0xff] %v89_v36  ;;  %v77_v44 = vsel %vm71_vm11, %v73_v16, %v61_v42  ;;  %v83_v45 = vsel %vm71_vm11, %v79_v20, %v67_v43 }
  0x29   :  { %v87_v47 = vmul.f32 %v77_v44, %v31_v39 }
  0x2a   :  { %v90_v46 = vadd.f32 %v86_v41, %v82_v38 }
  0x2b   :  { %v91_v48 = vadd.f32 %v87_v47, %v83_v45 }
  0x2c   :  { %94 = vst [vmem:[%s221_s4 + $0x10] sm:$0xff] %v90_v46 }
  0x2d   :  { %95 = vst [vmem:[%s221_s4 + $0x18] sm:$0xff] %v91_v48 }

</bundles_post_ra>
